<compile_context>
chip_gen: v7x
topology: tpu7x:2x2x1
jax: 0.10.0
libtpu: 0.0.40
codegen_flags: <defaults>
</compile_context>

<pallas_src>
import numpy as np

import jax
import jax.numpy as jnp
from jax.experimental import pallas as pl
from jax.experimental.pallas import tpu as pltpu


def _round_up(n: int, k: int) -> int:
    return (n + k - 1) // k * k


def _largest_tile(total: int, max_tile: int, unit: int) -> int:
    """Largest multiple of `unit` that divides `total` and is <= max(max_tile, unit).

    `total` must be a positive multiple of `unit`.
    """
    best = unit
    t = unit
    cap = max(max_tile, unit)
    while t <= total and t <= cap:
        if total % t == 0:
            best = t
        t += unit
    return best


def _chip_tuning():
    """Returns (lane multiple for d_hid/d_out padding, scoped-VMEM cap in bytes)."""
    try:
        kind = jax.devices()[0].device_kind.lower()
    except Exception:  # pragma: no cover - conservative fallback
        return 128, 96 << 20
    if "v7" in kind:
        return 256, 56 << 20   # 2x256^2 MXU, 64 MiB VMEM per TensorCore
    if "v6" in kind:
        return 256, 96 << 20   # 2x256^2 MXU, 128 MiB VMEM
    return 128, 96 << 20       # v5e and older: 4x128^2 MXU, 128 MiB VMEM


def prepare_ffn_params(w1, b1, w2, b2, *, matmul_dtype=jnp.bfloat16,
                       lane_multiple=None):
    """Pad + cast the FFN parameters ONCE (hoisted out of the per-call path).

    Weights are in (in, out) layout -- the transpose of PyTorch nn.Linear's
    (out, in) storage -- so the kernel computes x @ W directly on the MXU.
    """
    if lane_multiple is None:
        lane_multiple, _ = _chip_tuning()
    d_in, d_hid = w1.shape
    d_hid2, d_out = w2.shape
    assert d_hid == d_hid2 and b1.shape == (d_hid,) and b2.shape == (d_out,)

    d_in_p = _round_up(d_in, 128)
    d_hid_p = _round_up(d_hid, lane_multiple)
    d_out_p = _round_up(d_out, lane_multiple)

    w1p = jnp.pad(w1, ((0, d_in_p - d_in), (0, d_hid_p - d_hid))).astype(matmul_dtype)
    w2p = jnp.pad(w2, ((0, d_hid_p - d_hid), (0, d_out_p - d_out))).astype(matmul_dtype)
    b1p = jnp.pad(b1, (0, d_hid_p - d_hid)).astype(jnp.float32).reshape(1, d_hid_p)
    b2p = jnp.pad(b2, (0, d_out_p - d_out)).astype(jnp.float32).reshape(1, d_out_p)
    return dict(w1=w1p, b1=b1p, w2=w2p, b2=b2p, d_in=d_in, d_out=d_out)


def ffn_kernel(x_ref, w1_ref, b1_ref, w2_ref, b2_ref, o_ref, acc_ref):
    k = pl.program_id(1)

    @pl.when(k == 0)
    def _():
        acc_ref[...] = jnp.zeros_like(acc_ref)

    # dense1 chunk (MXU, f32 accumulate) + bias + ReLU (f32 on the VPU).
    h = jnp.dot(x_ref[...], w1_ref[...], preferred_element_type=jnp.float32)
    h = jnp.maximum(h + b1_ref[...], 0.0)
    # Explicit precision choice: downcast post-ReLU activations to bf16 for the
    # second MXU pass; accumulation stays f32 via preferred_element_type.
    acc_ref[...] += jnp.dot(h.astype(w2_ref.dtype), w2_ref[...],
                            preferred_element_type=jnp.float32)

    @pl.when(k == pl.num_programs(1) - 1)
    def _():
        o_ref[...] = (acc_ref[...] + b2_ref[...]).astype(o_ref.dtype)


def position_wise_ffn(x, params, *, tm=512, tk=512, out_dtype=None,
                      matmul_dtype=jnp.bfloat16, vmem_cap_bytes=None):
    """x: (..., d_in) -> (..., d_out) using pre-padded params from prepare_ffn_params."""
    w1p, b1p, w2p, b2p = params["w1"], params["b1"], params["w2"], params["b2"]
    d_out = params["d_out"]
    d_in_p, d_hid_p = w1p.shape
    d_out_p = w2p.shape[1]

    *lead, d_in = x.shape
    assert d_in == params["d_in"], "input feature dim does not match prepared params"
    out_dtype = x.dtype if out_dtype is None else out_dtype

    x2d = x.reshape(-1, d_in)
    m = x2d.shape[0]

    # Row tiling: bound padded-row waste to <=127 (<=15 for tiny inputs) and
    # pick a row tile that divides the padded row count exactly.
    if m >= 128:
        m_pad = _round_up(m, 128)
        tm_eff = _largest_tile(m_pad, tm, 128)
    else:
        m_pad = _round_up(m, 16)          # bf16 sublane pack
        tm_eff = m_pad
    # Hidden-dim reduction tile: multiple of 128 dividing d_hid_p.
    tk_eff = _largest_tile(d_hid_p, tk, 128)
    n_m = m_pad // tm_eff
    n_k = d_hid_p // tk_eff

    xp = jnp.pad(x2d, ((0, m_pad - m), (0, d_in_p - d_in))).astype(matmul_dtype)

    # Single-buffer any operand whose block index never changes across the grid.
    def spec(shape, index_map, *, constant=False):
        if constant:
            return pl.BlockSpec(shape, index_map, pipeline_mode=pl.Buffered(1))
        return pl.BlockSpec(shape, index_map)

    weights_constant = (n_k == 1)   # single hidden chunk -> W1/b1/W2 fully resident

    in_specs = [
        spec((tm_eff, d_in_p), lambda i, k: (i, 0)),                            # x rows (streamed over i)
        spec((d_in_p, tk_eff), lambda i, k: (0, k), constant=weights_constant),  # W1 column block
        spec((1, tk_eff), lambda i, k: (0, k), constant=weights_constant),       # b1 block (f32)
        spec((tk_eff, d_out_p), lambda i, k: (k, 0), constant=weights_constant),  # W2 row block
        spec((1, d_out_p), lambda i, k: (0, 0), constant=True),                  # b2 (f32, resident)
    ]
    out_specs = pl.BlockSpec((tm_eff, d_out_p), lambda i, k: (i, 0))

    # VMEM budget from actual residency; clamp to a per-chip safe cap.
    itemsize = np.dtype(matmul_dtype).itemsize
    out_itemsize = np.dtype(out_dtype).itemsize
    n_wbuf = 1 if weights_constant else 2
    vmem_needed = (
        2 * tm_eff * d_in_p * itemsize              # x tiles (double buffered)
        + n_wbuf * d_in_p * tk_eff * itemsize       # W1 block(s)
        + n_wbuf * 8 * tk_eff * 4                   # b1 block(s), sublane-padded
        + n_wbuf * tk_eff * d_out_p * itemsize      # W2 block(s)
        + 8 * d_out_p * 4                           # b2
        + 2 * tm_eff * d_out_p * out_itemsize       # out tiles (double buffered)
        + tm_eff * d_out_p * 4                      # f32 accumulator
        + tm_eff * tk_eff * (4 + itemsize)          # h intermediate (f32 + bf16 cast)
    )
    if vmem_cap_bytes is None:
        _, vmem_cap_bytes = _chip_tuning()
    vmem_limit = max(32 << 20, min(int(vmem_needed * 1.5) + (4 << 20), vmem_cap_bytes))

    cost = pl.CostEstimate(
        flops=2 * m_pad * (d_in_p * d_hid_p + d_hid_p * d_out_p),
        transcendentals=0,
        bytes_accessed=((m_pad * d_in_p + d_in_p * d_hid_p + d_hid_p * d_out_p) * itemsize
                        + (d_hid_p + d_out_p) * 4
                        + m_pad * d_out_p * out_itemsize),
    )

    out2d = pl.pallas_call(
        ffn_kernel,
        out_shape=jax.ShapeDtypeStruct((m_pad, d_out_p), out_dtype),
        grid_spec=pltpu.PrefetchScalarGridSpec(
            num_scalar_prefetch=0,
            grid=(n_m, n_k),                     # reduction (d_hid) axis last
            in_specs=in_specs,
            out_specs=out_specs,
            scratch_shapes=[pltpu.VMEM((tm_eff, d_out_p), jnp.float32)],
        ),
        compiler_params=pltpu.CompilerParams(
            dimension_semantics=("parallel", "arbitrary"),
            vmem_limit_bytes=vmem_limit,
        ),
        cost_estimate=cost,
    )(xp, w1p, b1p, w2p, b2p)

    return out2d[:m, :d_out].reshape(*lead, d_out)


if __name__ == "__main__":
    # Module hyper-params (LazyLinear infers d_in from the first call).
    batch, seq = 2, 8
    d_in = 32
    ffn_num_hiddens = 64
    ffn_num_outputs = 32

    key = jax.random.PRNGKey(0)
    kx, k1, kb1, k2, kb2 = jax.random.split(key, 5)

    x = jax.random.normal(kx, (batch, seq, d_in), dtype=jnp.float32)

    # PyTorch stores W as (out, in); we keep the transposed (in, out) layout so
    # the kernel does x @ W directly on the MXU.
    w1 = jax.random.normal(k1, (d_in, ffn_num_hiddens), dtype=jnp.float32) * 0.1
    b1 = jax.random.normal(kb1, (ffn_num_hiddens,), dtype=jnp.float32) * 0.1
    w2 = jax.random.normal(k2, (ffn_num_hiddens, ffn_num_outputs), dtype=jnp.float32) * 0.1
    b2 = jax.random.normal(kb2, (ffn_num_outputs,), dtype=jnp.float32) * 0.1

    # Pad/cast weights once (hoisted out of the per-call path).
    params = prepare_ffn_params(w1, b1, w2, b2)

    out = position_wise_ffn(x, params)
    out = jax.block_until_ready(out)

    # Pure-JAX f32 reference (dense2(relu(dense1(X)))). Kernel uses bf16 MXU
    # inputs with f32 accumulation -> bf16-level tolerance.
    ref = jnp.maximum(x.reshape(-1, d_in) @ w1 + b1, 0.0) @ w2 + b2
    ref = ref.reshape(batch, seq, ffn_num_outputs)
    assert out.shape == (batch, seq, ffn_num_outputs)
    max_err = float(jnp.max(jnp.abs(out - ref)))
    assert jnp.allclose(out, ref, atol=2e-2, rtol=2e-2), max_err

    print("KERNEL_OK")
</pallas_src>

<mosaic_0001>
module attributes {stable_mosaic.version = 11 : i64} {
  func.func @ffn_kernel(%arg0: i32, %arg1: i32, %arg2: memref<16x128xbf16, #tpu.memory_space<vmem>>, %arg3: memref<128x128xbf16, #tpu.memory_space<vmem>>, %arg4: memref<1x128xf32, #tpu.memory_space<vmem>>, %arg5: memref<128x128xbf16, #tpu.memory_space<vmem>>, %arg6: memref<1x128xf32, #tpu.memory_space<vmem>>, %arg7: memref<16x128xf32, #tpu.memory_space<vmem>>, %arg8: memref<16x128xf32, #tpu.memory_space<vmem>>) attributes {dimension_semantics = [#tpu.dimension_semantics<parallel>, #tpu.dimension_semantics<arbitrary>], iteration_bounds = array<i64: 1, 1>, scalar_prefetch = 0 : i64, scratch_operands = 1 : i64, tpu.core_type = #tpu.core_type<tc>, window_params = [{transform_indices = @transform_0, window_bounds = array<i64: 16, 128>}, {pipeline_mode = #tpu.pipeline_mode<synchronous>, transform_indices = @transform_1, window_bounds = array<i64: 128, 128>}, {pipeline_mode = #tpu.pipeline_mode<synchronous>, transform_indices = @transform_2, window_bounds = array<i64: 1, 128>}, {pipeline_mode = #tpu.pipeline_mode<synchronous>, transform_indices = @transform_3, window_bounds = array<i64: 128, 128>}, {pipeline_mode = #tpu.pipeline_mode<synchronous>, transform_indices = @transform_4, window_bounds = array<i64: 1, 128>}, {transform_indices = @transform_5, window_bounds = array<i64: 16, 128>}]} {
    %c0_i32 = arith.constant 0 : i32
    %0 = arith.cmpi eq, %arg1, %c0_i32 : i32
    %1 = arith.extui %0 : i1 to i32
    %c0_i32_0 = arith.constant 0 : i32
    %2 = arith.cmpi ne, %1, %c0_i32_0 : i32
    scf.if %2 {
      %cst_16 = arith.constant 0.000000e+00 : f32
      %20 = vector.broadcast %cst_16 : f32 to vector<16x128xf32>
      %c0_17 = arith.constant 0 : index
      %c0_18 = arith.constant 0 : index
      %21 = vector.load %arg8[%c0_17, %c0_18] : memref<16x128xf32, #tpu.memory_space<vmem>>, vector<16x128xf32>
      tpu.vector_store %arg8[%c0_17, %c0_18], %20 {strides = array<i32>} : memref<16x128xf32, #tpu.memory_space<vmem>>, vector<16x128xf32>,
    } else {
    }
    %c0 = arith.constant 0 : index
    %c0_1 = arith.constant 0 : index
    %3 = vector.load %arg2[%c0, %c0_1] : memref<16x128xbf16, #tpu.memory_space<vmem>>, vector<16x128xbf16>
    %c0_2 = arith.constant 0 : index
    %c0_3 = arith.constant 0 : index
    %4 = vector.load %arg3[%c0_2, %c0_3] : memref<128x128xbf16, #tpu.memory_space<vmem>>, vector<128x128xbf16>
    %cst = arith.constant dense<0.000000e+00> : vector<16x128xf32>
    %5 = tpu.matmul %3, %4, %cst {dimension_numbers = #tpu.dot_dimension_numbers<[1], [0], [0], [1], [0, 0, 1, 1], [], []>} : vector<16x128xbf16>, vector<128x128xbf16>, vector<16x128xf32> -> vector<16x128xf32>
    %c0_4 = arith.constant 0 : index
    %c0_5 = arith.constant 0 : index
    %6 = vector.load %arg4[%c0_4, %c0_5] : memref<1x128xf32, #tpu.memory_space<vmem>>, vector<1x128xf32>
    %7 = vector.broadcast %6 : vector<1x128xf32> to vector<16x128xf32>
    %8 = arith.addf %5, %7 : vector<16x128xf32>
    %cst_6 = arith.constant 0.000000e+00 : f32
    %9 = vector.broadcast %cst_6 : f32 to vector<16x128xf32>
    %10 = arith.maximumf %8, %9 : vector<16x128xf32>
    %c0_7 = arith.constant 0 : index
    %c0_8 = arith.constant 0 : index
    %11 = vector.load %arg8[%c0_7, %c0_8] : memref<16x128xf32, #tpu.memory_space<vmem>>, vector<16x128xf32>
    %12 = arith.truncf %10 : vector<16x128xf32> to vector<16x128xbf16>
    %c0_9 = arith.constant 0 : index
    %c0_10 = arith.constant 0 : index
    %13 = vector.load %arg5[%c0_9, %c0_10] : memref<128x128xbf16, #tpu.memory_space<vmem>>, vector<128x128xbf16>
    %cst_11 = arith.constant dense<0.000000e+00> : vector<16x128xf32>
    %14 = tpu.matmul %12, %13, %cst_11 {dimension_numbers = #tpu.dot_dimension_numbers<[1], [0], [0], [1], [0, 0, 1, 1], [], []>} : vector<16x128xbf16>, vector<128x128xbf16>, vector<16x128xf32> -> vector<16x128xf32>
    %15 = arith.addf %11, %14 : vector<16x128xf32>
    %c0_12 = arith.constant 0 : index
    %c0_13 = arith.constant 0 : index
    %16 = vector.load %arg8[%c0_12, %c0_13] : memref<16x128xf32, #tpu.memory_space<vmem>>, vector<16x128xf32>
    tpu.vector_store %arg8[%c0_12, %c0_13], %15 {strides = array<i32>} : memref<16x128xf32, #tpu.memory_space<vmem>>, vector<16x128xf32>,
    %c0_i32_14 = arith.constant 0 : i32
    %17 = arith.cmpi eq, %arg1, %c0_i32_14 : i32
    %18 = arith.extui %17 : i1 to i32
    %c0_i32_15 = arith.constant 0 : i32
    %19 = arith.cmpi ne, %18, %c0_i32_15 : i32
    scf.if %19 {
      %c0_16 = arith.constant 0 : index
      %c0_17 = arith.constant 0 : index
      %20 = vector.load %arg8[%c0_16, %c0_17] : memref<16x128xf32, #tpu.memory_space<vmem>>, vector<16x128xf32>
      %c0_18 = arith.constant 0 : index
      %c0_19 = arith.constant 0 : index
      %21 = vector.load %arg6[%c0_18, %c0_19] : memref<1x128xf32, #tpu.memory_space<vmem>>, vector<1x128xf32>
      %22 = vector.broadcast %21 : vector<1x128xf32> to vector<16x128xf32>
      %23 = arith.addf %20, %22 : vector<16x128xf32>
      %c0_20 = arith.constant 0 : index
      %c0_21 = arith.constant 0 : index
      %24 = vector.load %arg7[%c0_20, %c0_21] : memref<16x128xf32, #tpu.memory_space<vmem>>, vector<16x128xf32>
      tpu.vector_store %arg7[%c0_20, %c0_21], %23 {strides = array<i32>} : memref<16x128xf32, #tpu.memory_space<vmem>>, vector<16x128xf32>,
    } else {
    }
    return
  }
  func.func @transform_0(%arg0: i32, %arg1: i32) -> (i32, i32) {
    %c0_i32 = arith.constant 0 : i32
    %c0_i32_0 = arith.constant 0 : i32
    return %arg0, %c0_i32 : i32, i32
  }
  func.func @transform_1(%arg0: i32, %arg1: i32) -> (i32, i32) {
    %c0_i32 = arith.constant 0 : i32
    %c0_i32_0 = arith.constant 0 : i32
    return %c0_i32, %arg1 : i32, i32
  }
  func.func @transform_2(%arg0: i32, %arg1: i32) -> (i32, i32) {
    %c0_i32 = arith.constant 0 : i32
    %c0_i32_0 = arith.constant 0 : i32
    return %c0_i32, %arg1 : i32, i32
  }
  func.func @transform_3(%arg0: i32, %arg1: i32) -> (i32, i32) {
    %c0_i32 = arith.constant 0 : i32
    %c0_i32_0 = arith.constant 0 : i32
    return %arg1, %c0_i32 : i32, i32
  }
  func.func @transform_4(%arg0: i32, %arg1: i32) -> (i32, i32) {
    %c0_i32 = arith.constant 0 : i32
    %c0_i32_0 = arith.constant 0 : i32
    %c0_i32_1 = arith.constant 0 : i32
    return %c0_i32, %c0_i32_0 : i32, i32
  }
  func.func @transform_5(%arg0: i32, %arg1: i32) -> (i32, i32) {
    %c0_i32 = arith.constant 0 : i32
    %c0_i32_0 = arith.constant 0 : i32
    return %arg0, %c0_i32 : i32, i32
  }
}

</mosaic_0001>

<bundles_post_ra>
// kernel: tpu_custom_call.1
= control target key start
LH: loop header
LB: loop body
LE: loop exit
PB: predicated region body
PF: predicated region fallthrough
CT: control target
= control target key end

     0   :  { %10 = vsyncpa [#allocation4], 0  ;;  %s645_s0 = inlined_call_operand.hbm [shape: bf16[16,128], index: 0, kind: input, shape index: {}]   ;;  %s646_s1 = inlined_call_operand.hbm [shape: bf16[128,128], index: 1, kind: input, shape index: {}]   ;;  %s647_s2 = inlined_call_operand.vmem [shape: f32[1,128], index: 2, kind: input, shape index: {}]   ;;  %s648_s3 = inlined_call_operand.hbm [shape: bf16[128,128], index: 3, kind: input, shape index: {}]   ;;  %s649_s4 = inlined_call_operand.vmem [shape: f32[1,128], index: 4, kind: input, shape index: {}]   ;;  %s650_s5 = inlined_call_operand.hbm [shape: f32[16,128], index: 5, kind: output, shape index: {}]  }
   0x1   :  { %11 = vsyncpa [#allocation7], 0 }
   0x2   :  { %12 = vsyncpa [#allocation5], 0  ;;  %s535_s18 = smov [#allocation6]   ;;  %s536_s20 = smov [#allocation3]  }
   0x3   :  { %s30_s19 = sshll.u32 %s535_s18, 4  ;;  %s18_s21 = sshll.u32 %s536_s20, 4  ;;  %s31_s19 = int_to_ptr.vmem [resolvable:$true] %s30_s19  ;;  %s575_s21 = int_to_ptr.vmem [resolvable:$true] %s18_s21 }
   0x4   :  { %s441_s24 = scalar_lea.hbm %s646_s1, 1024 }
   0x5   :  { %p442_p0 = scmp.ne.s32.totalorder %s646_s1, %s441_s24  ;;  %p445_p1 = scmp.lt.u32.totalorder %s441_s24, %s646_s1 }
   0x7   :  { %p447_p2 = pnand %p445_p1, %p442_p0 }
   0x9   :  { %450 = shalt.err (!%p447_p2)
}
   0xa   :  { %s451_s29 = scalar_lea.vmem %s31_s19, 1024  ;;  %p456_p4 = scmp.lt.s32.totalorder %s31_s19, %s31_s19 }
   0xb   :  { %p452_p3 = scmp.ne.s32.totalorder %s31_s19, %s451_s29  ;;  %p457_p5 = scmp.lt.s32.totalorder %s451_s29, %s451_s29 }
   0xd   :  { %p458_p6 = por %p457_p5, %p456_p4 }
   0xf   :  { %p459_p7 = pnand %p458_p6, %p452_p3 }
  0x11   :  { %462 = shalt.err (!%p459_p7)
}
  0x12   :  { %s537_s30 = smov 64   ;;  %s538_s6 = smov 4  }
  0x13   :  { %36 = dma.hbm_to_vmem [thread:$0]  %s646_s1, 1024, %s31_s19, [#allocation7], %s537_s30, %s537_s30, %s538_s6  }
  0x14   :  { %s463_s11 = scalar_lea.hbm %s645_s0, 128 }
  0x15   :  { %p464_p8 = scmp.ne.s32.totalorder %s645_s0, %s463_s11  ;;  %p467_p9 = scmp.lt.u32.totalorder %s463_s11, %s645_s0 }
  0x17   :  { %p469_p10 = pnand %p467_p9, %p464_p8 }
  0x19   :  { %472 = shalt.err (!%p469_p10)
}
  0x1a   :  { %s473_s16 = scalar_lea.vmem %s575_s21, 128  ;;  %p478_p12 = scmp.lt.s32.totalorder %s575_s21, %s575_s21 }
  0x1b   :  { %p474_p11 = scmp.ne.s32.totalorder %s575_s21, %s473_s16  ;;  %p479_p13 = scmp.lt.s32.totalorder %s473_s16, %s473_s16 }
  0x1d   :  { %p480_p0 = por %p479_p13, %p478_p12 }
  0x1f   :  { %p481_p1 = pnand %p480_p0, %p474_p11 }
  0x21   :  { %484 = shalt.err (!%p481_p1)
}
  0x22   :  { %24 = dma.hbm_to_vmem [thread:$0]  %s645_s0, 128, %s575_s21, [#allocation4], %s537_s30, %s537_s30, %s538_s6  }
  0x23   :  { %s539_s18 = smov [#allocation8]   ;;  %s485_s23 = scalar_lea.hbm %s648_s3, 1024 }
  0x24   :  { %s44_s19 = sshll.u32 %s539_s18, 4  ;;  %p486_p2 = scmp.ne.s32.totalorder %s648_s3, %s485_s23  ;;  %s45_s19 = int_to_ptr.vmem [resolvable:$true] %s44_s19 }
  0x25   :  { %p489_p3 = scmp.lt.u32.totalorder %s485_s23, %s648_s3 }
  0x27   :  { %p491_p4 = pnand %p489_p3, %p486_p2 }
  0x29   :  { %494 = shalt.err (!%p491_p4)
}
  0x2a   :  { %s495_s28 = scalar_lea.vmem %s45_s19, 1024  ;;  %p500_p6 = scmp.lt.s32.totalorder %s45_s19, %s45_s19 }
  0x2b   :  { %p496_p5 = scmp.ne.s32.totalorder %s45_s19, %s495_s28  ;;  %p501_p7 = scmp.lt.s32.totalorder %s495_s28, %s495_s28 }
  0x2d   :  { %p502_p8 = por %p501_p7, %p500_p6 }
  0x2f   :  { %p503_p9 = pnand %p502_p8, %p496_p5 }
  0x31   :  { %506 = shalt.err (!%p503_p9)
}
  0x32   :  { %50 = dma.hbm_to_vmem [thread:$0]  %s648_s3, 1024, %s45_s19, [#allocation7], %s537_s30, %s537_s30, %s538_s6  }
  0x33   :  { %529 = dma.done.wait [#allocation4], 128  }
  0x34   :  { %530 = vsyncadd [#allocation4], 4294967168 }
  0x35   :  { %531 = dma.done.wait [#allocation7], 2048  }
  0x36   :  { %532 = vsyncadd [#allocation7], 4294965248  ;;  %v540_v0 = vmov 0.0   ;;  %vm541_vm0 = vmmov 0   ;;  %v424_v1 = vld [vmem:[#allocation6] sm:$0xff]   ;;  %v425_v2 = vld [vmem:[#allocation6 + $0x8] sm:$0xff]  }
  0x37   :  { %374 = vmatprep.subr.bf16.mxu0 %v540_v0  ;;  %390 = vmatprep.mubr.msk.bf16.mxu0 %vm541_vm0, %v540_v0  ;;  %v426_v3 = vld [vmem:[#allocation6 + $0x10] sm:$0xff]   ;;  %v433_v4 = vld [vmem:[#allocation8] sm:$0xff]   ;;  %v427_v5 = vld [vmem:[#allocation6 + $0x18] sm:$0xff]   ;;  %s542_s7 = smov [#allocation9]  }
  0x38   :  { %394 = vmatprep.subr.bf16.mxu1 %v540_v0  ;;  %410 = vmatprep.mubr.msk.bf16.mxu1 %vm541_vm0, %v540_v0  ;;  %v434_v6 = vld [vmem:[#allocation8 + $0x8] sm:$0xff]   ;;  %v428_v7 = vld [vmem:[#allocation6 + $0x20] sm:$0xff]   ;;  %v435_v8 = vld [vmem:[#allocation8 + $0x10] sm:$0xff]   ;;  %s324_s8 = sshll.u32 %s542_s7, 4  ;;  %s325_s8 = int_to_ptr.vmem [resolvable:$true] %s324_s8 }
  0x39   :  { %375 = vmatpush3.bf16.msra.mxu0 %v424_v1  ;;  %395 = vmatpush3.bf16.msra.mxu1 %v433_v4  ;;  %v429_v9 = vld [vmem:[#allocation6 + $0x28] sm:$0xff]   ;;  %v436_v10 = vld [vmem:[#allocation8 + $0x18] sm:$0xff]   ;;  %v430_v11 = vld [vmem:[#allocation6 + $0x30] sm:$0xff]   ;;  %p512_p11 = scmp.lt.s32.totalorder %s325_s8, %s325_s8 }
  0x3a   :  { %376 = vmatprep.subr.bf16.mxu0 %v540_v0  ;;  %396 = vmatprep.subr.bf16.mxu1 %v540_v0  ;;  %v437_v12 = vld [vmem:[#allocation8 + $0x20] sm:$0xff]   ;;  %v431_v13 = vld [vmem:[#allocation6 + $0x38] sm:$0xff]   ;;  %v438_v14 = vld [vmem:[#allocation8 + $0x28] sm:$0xff]  }
  0x3b   :  { %v432_v15 = vld [vmem:[#allocation3] sm:$0xff]   ;;  %v439_v16 = vld [vmem:[#allocation8 + $0x30] sm:$0xff]  }
  0x3c   :  { %v440_v17 = vld [vmem:[#allocation8 + $0x38] sm:$0xff]  }
  0x3d   :  { %377 = vmatpush3.bf16.msra.mxu0 %v425_v2  ;;  %397 = vmatpush3.bf16.msra.mxu1 %v434_v6  ;;  %v337_v18 = vld [vmem:[%s647_s2] ss:$0 sm:$0xff]  ;;  %s507_s2 = scalar_lea.vmem %s325_s8, 256 }
  0x3e   :  { %378 = vmatprep.subr.bf16.mxu0 %v540_v0  ;;  %398 = vmatprep.subr.bf16.mxu1 %v540_v0  ;;  %v355_v28 = vld [vmem:[%s649_s4] ss:$0 sm:$0xff]  ;;  %p508_p10 = scmp.ne.s32.totalorder %s325_s8, %s507_s2  ;;  %p513_p12 = scmp.lt.s32.totalorder %s507_s2, %s507_s2 }
  0x40   :  { %p514_p13 = por %p513_p12, %p512_p11 }
  0x41   :  { %379 = vmatpush3.bf16.msra.mxu0 %v426_v3  ;;  %399 = vmatpush3.bf16.msra.mxu1 %v435_v8 }
  0x42   :  { %380 = vmatprep.subr.bf16.mxu0 %v540_v0  ;;  %400 = vmatprep.subr.bf16.mxu1 %v540_v0  ;;  %p515_p0 = pnand %p514_p13, %p508_p10 }
  0x45   :  { %381 = vmatpush3.bf16.msra.mxu0 %v427_v5  ;;  %401 = vmatpush3.bf16.msra.mxu1 %v436_v10 }
  0x46   :  { %382 = vmatprep.subr.bf16.mxu0 %v540_v0  ;;  %402 = vmatprep.subr.bf16.mxu1 %v540_v0 }
  0x49   :  { %383 = vmatpush3.bf16.msra.mxu0 %v428_v7  ;;  %403 = vmatpush3.bf16.msra.mxu1 %v437_v12 }
  0x4a   :  { %384 = vmatprep.subr.bf16.mxu0 %v540_v0  ;;  %404 = vmatprep.subr.bf16.mxu1 %v540_v0 }
  0x4d   :  { %385 = vmatpush3.bf16.msra.mxu0 %v429_v9  ;;  %405 = vmatpush3.bf16.msra.mxu1 %v438_v14 }
  0x4e   :  { %386 = vmatprep.subr.bf16.mxu0 %v540_v0  ;;  %406 = vmatprep.subr.bf16.mxu1 %v540_v0 }
  0x51   :  { %387 = vmatpush3.bf16.msra.mxu0 %v430_v11  ;;  %407 = vmatpush3.bf16.msra.mxu1 %v439_v16 }
  0x52   :  { %388 = vmatprep.subr.bf16.mxu0 %v540_v0  ;;  %408 = vmatprep.subr.bf16.mxu1 %v540_v0 }
  0x55   :  { %389 = vmatpush3.bf16.msra.mxu0 %v431_v13  ;;  %409 = vmatpush3.bf16.msra.mxu1 %v440_v17 }
  0x58   :  { %391 = vmatmul.mubr.bf16.vlgmr.msra.gmra.mrb[0].mxu0 %v432_v15 }
 0x12b   :  { %v182_v19 = vpop.f32.mrb[0].mxu0 }
 0x12c   :  { %v183_v20 = vadd.f32 %v337_v18, %v182_v19  ;;  %v392_v21 = vpop.f32.mrb[1].mxu0 }
 0x12d   :  { %v185_v22 = vpop.f32.mrb[2].mxu0 }
 0x12e   :  { %v186_v23 = vadd.f32 %v337_v18, %v185_v22  ;;  %v393_v24 = vpop.f32.mrb[3].mxu0  ;;  %v189_v25 = vmax.f32 %v183_v20, 0.0 }
 0x130   :  { %v190_v26 = vmax.f32 %v186_v23, 0.0 }
 0x132   :  { %v193_v27 = vpack.c.bf16 %v190_v26, %v189_v25 }
 0x134   :  { %411 = vmatmul.mubr.bf16.vlgmr.msra.gmra.mrb[0].mxu1 %v193_v27 }
 0x207   :  { %v292_v29 = vpop.f32.mrb[0].mxu1 }
 0x208   :  { %v315_v30 = vadd.f32 %v355_v28, %v292_v29  ;;  %v412_v31 = vpop.f32.mrb[1].mxu1 }
 0x209   :  { %v295_v32 = vpop.f32.mrb[2].mxu1 }
 0x20a   :  { %317 = vst [vmem:[#allocation9] sm:$0xff] %v315_v30  ;;  %v316_v33 = vadd.f32 %v355_v28, %v295_v32  ;;  %v413_v34 = vpop.f32.mrb[3].mxu1 }
 0x20c   :  { %318 = vst [vmem:[#allocation9 + $0x8] sm:$0xff] %v316_v33 }
 0x20d   :  { %518 = shalt.err (!%p515_p0)
}
 0x20e   :  { %s519_s10 = scalar_lea.hbm %s650_s5, 256 }
 0x20f   :  { %p520_p1 = scmp.ne.s32.totalorder %s650_s5, %s519_s10  ;;  %p523_p2 = scmp.lt.u32.totalorder %s519_s10, %s650_s5 }
 0x211   :  { %p525_p3 = pnand %p523_p2, %p520_p1 }
 0x213   :  { %528 = shalt.err (!%p525_p3)
}
 0x214   :  { %s543_s15 = smov 128   ;;  %s544_s16 = smov 8  }
 0x215   :  { %330 = dma.vmem_to_hbm [thread:$0]  %s325_s8, 256, %s650_s5, [#allocation5], %s543_s15, %s543_s15, %s544_s16  }
 0x216   :  { %533 = dma.done.wait [#allocation5], 256  }
 0x217   :  { %534 = vsyncadd [#allocation5], 4294967040 }
 0x218   :  { %334 = vsyncpa [#allocation4], 1 }
 0x219   :  { %335 = vsyncpa [#allocation7], 1 }
 0x21a   :  { %336 = vsyncpa [#allocation5], 1 }

</bundles_post_ra>
